<compile_context>
chip_gen: v7x
topology: tpu7x:2x2x1
jax: 0.10.0
libtpu: 0.0.40
codegen_flags: <defaults>
</compile_context>

<pallas_src>
import math
import functools

import jax
import jax.numpy as jnp
from jax.experimental import pallas as pl
from jax.experimental.pallas import tpu as pltpu


# --------------------------------------------------------------------------- #
# Kernels
# --------------------------------------------------------------------------- #
def _pe_add_kernel(x_ref, pe_ref, o_ref):
    # x_ref: (1, R, L) tile for one batch element; pe_ref: (R, L) shared tile.
    o_ref[...] = (x_ref[...] + pe_ref[...][None, :, :]).astype(o_ref.dtype)


def _pe_add_dropout_kernel(x_ref, pe_ref, u_ref, o_ref, *, p):
    # Inverted dropout: keep with prob (1 - p), scale kept values by 1/(1-p).
    y = x_ref[...] + pe_ref[...][None, :, :]
    keep = u_ref[...] >= jnp.float32(p)          # P(keep) = 1 - p
    scale = jnp.asarray(1.0 / (1.0 - p), y.dtype)
    o_ref[...] = jnp.where(keep, y * scale, jnp.zeros((), y.dtype)).astype(o_ref.dtype)


# --------------------------------------------------------------------------- #
# PE table (constant buffer in the PyTorch module) — plain-JAX glue.
# --------------------------------------------------------------------------- #
def make_positional_encoding_table(d_model, max_len=100):
    position = jnp.arange(max_len, dtype=jnp.float32)[:, None]            # (max_len, 1)
    div_term = jnp.exp(
        jnp.arange(0, d_model, 2, dtype=jnp.float32) * (-math.log(10000.0) / d_model)
    )                                                                      # (d_model//2,)
    angles = position * div_term                                           # (max_len, d//2)
    pe = jnp.zeros((max_len, d_model), dtype=jnp.float32)
    pe = pe.at[:, 0::2].set(jnp.sin(angles))
    pe = pe.at[:, 1::2].set(jnp.cos(angles))
    return pe


def _pick_row_tile(rows, max_rows=2048):
    """Largest row tile <= max_rows that evenly divides `rows` (mult of 8),
    or the full extent if it already fits."""
    if rows <= max_rows:
        return rows
    for t in (2048, 1024, 512, 256, 128, 64, 32, 16, 8):
        if t <= max_rows and rows % t == 0:
            return t
    return rows  # fall back to full extent (still correct, just bigger block)


# --------------------------------------------------------------------------- #
# Forward
# --------------------------------------------------------------------------- #
def positional_encoding_forward(x, pe_table, *, dropout_p=0.1, train=True, rng_key=None):
    """x: (B, N, D).  Returns dropout(x + pe[:N, :]) with inverted dropout."""
    B, N, D = x.shape
    out_dtype = x.dtype
    pe_slice = pe_table[:N, :].astype(x.dtype)            # (N, D)

    apply_dropout = bool(train) and float(dropout_p) > 0.0
    if apply_dropout:
        if rng_key is None:
            rng_key = jax.random.PRNGKey(0)
        u = jax.random.uniform(rng_key, x.shape, dtype=jnp.float32)

    total = N * D
    if total % 128 == 0:
        # Lane-dense path: view each batch element as (rows, 128).
        R = total // 128
        tile_r = _pick_row_tile(R)
        xr = x.reshape(B, R, 128)
        per = pe_slice.reshape(R, 128)
        grid = (B, R // tile_r)
        x_spec = pl.BlockSpec((1, tile_r, 128), lambda b, r: (b, r, 0))
        pe_spec = pl.BlockSpec((tile_r, 128), lambda b, r: (r, 0))
        out_spec = pl.BlockSpec((1, tile_r, 128), lambda b, r: (b, r, 0))
        dims = ("parallel", "parallel")
        out_struct = jax.ShapeDtypeStruct((B, R, 128), out_dtype)
        ur = u.reshape(B, R, 128) if apply_dropout else None
    else:
        # Fallback: full-(N, D) block per batch element (block == full dims).
        xr, per = x, pe_slice
        grid = (B,)
        x_spec = pl.BlockSpec((1, N, D), lambda b: (b, 0, 0))
        pe_spec = pl.BlockSpec((N, D), lambda b: (0, 0))
        out_spec = pl.BlockSpec((1, N, D), lambda b: (b, 0, 0))
        dims = ("parallel",)
        out_struct = jax.ShapeDtypeStruct((B, N, D), out_dtype)
        ur = u if apply_dropout else None

    if apply_dropout:
        kernel = functools.partial(_pe_add_dropout_kernel, p=float(dropout_p))
        in_specs = [x_spec, pe_spec,
                    pl.BlockSpec(x_spec.block_shape, x_spec.index_map)]  # mask tiles like x
        args = (xr, per, ur)
    else:
        kernel = _pe_add_kernel
        in_specs = [x_spec, pe_spec]
        args = (xr, per)

    y = pl.pallas_call(
        kernel,
        out_shape=out_struct,
        grid=grid,
        in_specs=in_specs,
        out_specs=out_spec,
        compiler_params=pltpu.CompilerParams(dimension_semantics=dims),
    )(*args)

    return y.reshape(B, N, D)


# --------------------------------------------------------------------------- #
# Smoke test
# --------------------------------------------------------------------------- #
if __name__ == "__main__":
    B, N, D = 2, 8, 32          # batch x steps x embed
    MAX_LEN = 100
    DROPOUT_P = 0.1

    root = jax.random.PRNGKey(0)
    x_key, drop_key = jax.random.split(root)
    x = jax.random.normal(x_key, (B, N, D), dtype=jnp.float32)

    pe_table = make_positional_encoding_table(D, max_len=MAX_LEN)

    # Training-mode forward (PE add + inverted dropout).
    y_train = positional_encoding_forward(
        x, pe_table, dropout_p=DROPOUT_P, train=True, rng_key=drop_key
    )
    jax.block_until_ready(y_train)

    # Eval-mode forward (dropout is identity) — check against pure-JAX reference.
    y_eval = positional_encoding_forward(x, pe_table, dropout_p=DROPOUT_P, train=False)
    jax.block_until_ready(y_eval)

    ref = x + pe_table[None, :N, :]
    assert jnp.allclose(y_eval, ref, atol=1e-5, rtol=1e-5), "eval-mode mismatch"
    assert y_train.shape == (B, N, D) and y_train.dtype == x.dtype

    # Every surviving element in train mode must equal (x + pe) / (1 - p).
    kept = y_train != 0.0
    scaled_ref = ref / (1.0 - DROPOUT_P)
    assert jnp.allclose(
        jnp.where(kept, y_train, 0.0), jnp.where(kept, scaled_ref, 0.0),
        atol=1e-5, rtol=1e-5,
    ), "train-mode mismatch"

    print("KERNEL_OK")
</pallas_src>

<mosaic_0001>
module attributes {stable_mosaic.version = 11 : i64} {
  func.func @_pe_add_dropout_kernel(%arg0: i32, %arg1: i32, %arg2: memref<1x2x128xf32, #tpu.memory_space<vmem>>, %arg3: memref<2x128xf32, #tpu.memory_space<vmem>>, %arg4: memref<1x2x128xf32, #tpu.memory_space<vmem>>, %arg5: memref<1x2x128xf32, #tpu.memory_space<vmem>>) attributes {dimension_semantics = [#tpu.dimension_semantics<parallel>, #tpu.dimension_semantics<parallel>], iteration_bounds = array<i64: 2, 1>, scalar_prefetch = 0 : i64, scratch_operands = 0 : i64, tpu.core_type = #tpu.core_type<tc>, window_params = [{transform_indices = @transform_0, window_bounds = array<i64: 1, 2, 128>}, {transform_indices = @transform_1, window_bounds = array<i64: 2, 128>}, {transform_indices = @transform_2, window_bounds = array<i64: 1, 2, 128>}, {transform_indices = @transform_3, window_bounds = array<i64: 1, 2, 128>}]} {
    %c0 = arith.constant 0 : index
    %c0_0 = arith.constant 0 : index
    %c0_1 = arith.constant 0 : index
    %0 = vector.load %arg2[%c0, %c0_0, %c0_1] : memref<1x2x128xf32, #tpu.memory_space<vmem>>, vector<1x2x128xf32>
    %c0_2 = arith.constant 0 : index
    %c0_3 = arith.constant 0 : index
    %1 = vector.load %arg3[%c0_2, %c0_3] : memref<2x128xf32, #tpu.memory_space<vmem>>, vector<2x128xf32>
    %2 = vector.shape_cast %1 : vector<2x128xf32> to vector<1x2x128xf32>
    %3 = arith.addf %0, %2 : vector<1x2x128xf32>
    %c0_4 = arith.constant 0 : index
    %c0_5 = arith.constant 0 : index
    %c0_6 = arith.constant 0 : index
    %4 = vector.load %arg4[%c0_4, %c0_5, %c0_6] : memref<1x2x128xf32, #tpu.memory_space<vmem>>, vector<1x2x128xf32>
    %cst = arith.constant 1.000000e-01 : f32
    %5 = vector.broadcast %cst : f32 to vector<1x2x128xf32>
    %6 = arith.cmpf oge, %4, %5 : vector<1x2x128xf32>
    %cst_7 = arith.constant 1.11111116 : f32
    %7 = vector.broadcast %cst_7 : f32 to vector<1x2x128xf32>
    %8 = arith.mulf %3, %7 : vector<1x2x128xf32>
    %cst_8 = arith.constant 0.000000e+00 : f32
    %9 = vector.broadcast %cst_8 : f32 to vector<1x2x128xf32>
    %10 = arith.select %6, %8, %9 : vector<1x2x128xi1>, vector<1x2x128xf32>
    %c0_9 = arith.constant 0 : index
    %c0_10 = arith.constant 0 : index
    %c0_11 = arith.constant 0 : index
    %11 = vector.load %arg5[%c0_9, %c0_10, %c0_11] : memref<1x2x128xf32, #tpu.memory_space<vmem>>, vector<1x2x128xf32>
    tpu.vector_store %arg5[%c0_9, %c0_10, %c0_11], %10 {strides = array<i32>} : memref<1x2x128xf32, #tpu.memory_space<vmem>>, vector<1x2x128xf32>,
    return
  }
  func.func @transform_0(%arg0: i32, %arg1: i32) -> (i32, i32, i32) {
    %c0_i32 = arith.constant 0 : i32
    %c0_i32_0 = arith.constant 0 : i32
    return %arg0, %arg1, %c0_i32 : i32, i32, i32
  }
  func.func @transform_1(%arg0: i32, %arg1: i32) -> (i32, i32) {
    %c0_i32 = arith.constant 0 : i32
    %c0_i32_0 = arith.constant 0 : i32
    return %arg1, %c0_i32 : i32, i32
  }
  func.func @transform_2(%arg0: i32, %arg1: i32) -> (i32, i32, i32) {
    %c0_i32 = arith.constant 0 : i32
    %c0_i32_0 = arith.constant 0 : i32
    return %arg0, %arg1, %c0_i32 : i32, i32, i32
  }
  func.func @transform_3(%arg0: i32, %arg1: i32) -> (i32, i32, i32) {
    %c0_i32 = arith.constant 0 : i32
    %c0_i32_0 = arith.constant 0 : i32
    return %arg0, %arg1, %c0_i32 : i32, i32, i32
  }
}

</mosaic_0001>

<bundles_post_ra>
// kernel: tpu_custom_call.1
= control target key start
LH: loop header
LB: loop body
LE: loop exit
PB: predicated region body
PF: predicated region fallthrough
CT: control target
= control target key end

     0   :  { %8 = vsyncpa [#allocation3], 0  ;;  %s774_s0 = inlined_call_operand.hbm [shape: f32[2,2,128], index: 0, kind: input, shape index: {}]   ;;  %s775_s1 = inlined_call_operand.vmem [shape: f32[2,128], index: 1, kind: input, shape index: {}]   ;;  %s776_s2 = inlined_call_operand.vmem [shape: f32[2,2,128], index: 2, kind: input, shape index: {}]   ;;  %s777_s3 = inlined_call_operand.hbm [shape: f32[2,2,128], index: 3, kind: output, shape index: {}]  }
   0x1   :  { %10 = vsyncpa [#allocation3 + $0x1], 0 }
   0x2   :  { %11 = vsyncpa [#allocation4], 0 }
   0x3   :  { %13 = vsyncpa [#allocation4 + $0x1], 0  ;;  %s594_s12 = smov 0   ;;  %s596_s13 = smov 0  }
   0x4   :  { %s598_s14 = smov 0   ;;  %s600_s15 = smov 0  }
   0x5   :  { %s602_s16 = smov 0   ;;  %s604_s17 = smov 0  }
   0x6 LB: > { %s381_s18 = sadd.s32 4294967295, %s570_s17   ;;  %s382_s19 = sadd.s32 4294967294, %s570_s17   ;;  %s570_s17 = sphi %s604_s17, %s19_s17   ;;  %s566_s16 = sphi %s602_s16, %s793_s16   ;;  %s562_s15 = sphi %s600_s15, %s792_s15   ;;  %s558_s14 = sphi %s598_s14, %s791_s14   ;;  %s554_s13 = sphi %s596_s13, %s790_s13   ;;  %s550_s12 = sphi %s594_s12, %s789_s12  }
   0x7   : > { %s31_s20 = sadd.s32 1, %s566_s16  ;;  %s40_s21 = sadd.s32 1, %s558_s14 }
   0x8   : > { %p33_p0 = scmp.ge.s32.totalorder %s31_s20, 2  ;;  %p47_p1 = scmp.ne.s32.totalorder %s558_s14, %s554_s13 }
   0x9   : > { %p48_p2 = scmp.eq.s32.totalorder %s570_s17, 0  ;;  %p53_p3 = scmp.ne.s32.totalorder %s554_s13, %s550_s12 }
   0xa   : > { %s795_s20 = smov (%p33_p0, %s31_s20), 0  ;;  %p54_p5 = scmp.eq.s32.totalorder %s381_s18, 0 }
   0xb   : > { %p635_p4 = por %p48_p2, %p47_p1  ;;  %s35_s23 = ssub.s32 %s566_s16, %s795_s20 }
   0xc   : > { %p133_p6 = scmp.eq.s32.totalorder %s381_s18, 1  ;;  %p38_p7 = scmp.eq.s32.totalorder %s35_s23, 0 }
   0xd   : > { %p641_p8 = por %p54_p5, %p53_p3  ;;  %p139_p10 = scmp.eq.s32.totalorder %s382_s19, 1 }
   0xe   : > { %p645_p9 = por %p133_p6, %p47_p1  ;;  %p408_p13 = scmp.lt.s32.totalorder %s570_s17, 2 }
   0xf   : > { %s650_s26 = scalar_select %p38_p7, %s558_s14, %s40_s21  }
  0x10   : > { %s781_s25 = scalar_select %p645_p9, 1, 0 }
  0x11   : > { %p652_p11 = por %p139_p10, %p53_p3  ;;  %s166_s28 = sand.u32 1, %s558_s14  }
  0x12   : > { %s386_s29 = sshll.u32 %s166_s28, 1  ;;  %s387_s30 = sshll.u32 %s566_s16, 5 }
  0x13   : > { %s782_s27 = scalar_select %p652_p11, 1, 0 }
  0x14   : > { %s663_s6 = scalar_lea.hbm %s774_s0, %s387_s30  ;;  %s170_s7 = scalar_lea.vmem [#allocation2], %s386_s29 }
  0x15   : > { %s178_s8 = sshll.u32 %s170_s7, 4  ;;  %p669_p0 = pnand %p408_p13, %p635_p4  ;;  %s665_s8 = int_to_ptr.vmem [resolvable:$true] %s178_s8 }
  0x16   : > { %s167_s10 = scalar_lea.sflag [#allocation3], %s166_s28  ;;  %s458_s11 = scalar_lea.hbm %s663_s6, 32 }
  0x17   : > { %p459_p3 = scmp.ne.s32.totalorder %s663_s6, %s458_s11  ;;  %p460_p5 = pneg %p669_p0 }
  0x18   : > { %s463_s21 = scalar_lea.hbm %s774_s0, 64  ;;  %p464_p4 = scmp.lt.u32.totalorder %s663_s6, %s774_s0 }
  0x19   : > { %p461_p6 = pnand %p460_p5, %p459_p3  ;;  %p465_p10 = scmp.lt.u32.totalorder %s463_s21, %s458_s11 }
  0x1a   : > { %p467_p12 = scmp.lt.u32.totalorder %s458_s11, %s663_s6 }
  0x1b   : > { %p462_p7 = pneg %p461_p6  ;;  %p466_p13 = por %p465_p10, %p464_p4 }
  0x1d   : > { %p468_p1 = por %p467_p12, %p466_p13 }
  0x1f   : > { %p469_p2 = pnand %p468_p1, %p462_p7 }
  0x21   : > { %472 = shalt.err (!%p469_p2)
}
  0x22   : > { %s473_s28 = scalar_lea.vmem %s665_s8, 32  ;;  %s572_s29 = smov [#allocation2]  }
  0x23   : > { %p474_p3 = scmp.ne.s32.totalorder %s665_s8, %s473_s28  ;;  %s478_s30 = sshll.u32 %s572_s29, 4  ;;  %s479_s30 = int_to_ptr.vmem [resolvable:$false] %s478_s30 }
  0x24   : > { %s480_s4 = scalar_lea.vmem %s479_s30, 64  ;;  %p481_p9 = scmp.lt.s32.totalorder %s665_s8, %s479_s30 }
  0x25   : > { %p476_p6 = pnand %p474_p3, %p460_p5  ;;  %p482_p4 = scmp.lt.s32.totalorder %s480_s4, %s473_s28 }
  0x27   : > { %p477_p11 = pneg %p476_p6  ;;  %p483_p10 = por %p482_p4, %p481_p9 }
  0x29   : > { %p484_p12 = pnand %p483_p10, %p477_p11 }
  0x2b   : > { %487 = shalt.err (!%p484_p12)
}
  0x2c   : > { %403 = dma.hbm_to_vmem [thread:$0]  (!%p669_p0), %s663_s6, 32, %s665_s8, %s167_s10  }
  0x2d   : > { %p784_p1 = scmp.lt.s32.totalorder %s570_s17, 3  ;;  %p785_p2 = scmp.ge.s32.totalorder %s570_s17, 1 }
  0x2f   : > { %p194_p5 = pnand %p785_p2, %p784_p1 }
  0x30   : > { %s705_s5 = sand.u32 (!%p194_p5), 1, %s554_s13  }
  0x31   : > { %197 = sbr.rel (%p194_p5) target bundleno = 85 (0x55), region = 32  ;;  %s389_s7 = sshll.u32 (!%p194_p5), %s705_s5, 1 }
  0x32   : > { %s200_s11 = scalar_lea.sflag (!%p194_p5), [#allocation3], %s705_s5  ;;  %s203_s18 = scalar_lea.vmem (!%p194_p5), [#allocation2], %s389_s7 }
  0x38   : > { %541 = dma.done.wait (%p641_p8), %s200_s11, 32  }
  0x39   : > { %543 = vsyncadd (%p641_p8), %s200_s11, 4294967264  ;;  %p241_p9 = scmp.lt.s32.totalorder %s562_s15, 1  ;;  %v248_v0 = vld [vmem:[%s203_s18] sm:$0x3]  ;;  %s236_s24 = scalar_lea.vmem [#allocation5], %s389_s7 }
  0x3a   : > { %v249_v1 = vld [vmem:[%s775_s1] sm:$0x3]  ;;  %s271_s23 = sshll.u32 %s236_s24, 4  ;;  %s393_s28 = sshll.u32 %s562_s15, 5  ;;  %s722_s23 = int_to_ptr.vmem [resolvable:$true] %s271_s23 }
  0x3b   : > { %s242_s6 = scalar_select %p241_p9, %s562_s15, 1  ;;  %v250_v3 = vadd.f32 %v249_v1, %v248_v0 }
  0x3c   : > { %s727_s4 = scalar_lea.hbm %s777_s3, %s393_s28  ;;  %s257_s11 = scalar_lea.sflag [#allocation4], %s705_s5 }
  0x3d   : > { %s391_s8 = sshll.u32 %s242_s6, 1  ;;  %v253_v4 = vmul.f32 1.1111112, %v250_v3  ;;  %s488_s18 = scalar_lea.vmem %s722_s23, 32 }
  0x3e   : > { %s247_s19 = scalar_lea.vmem %s776_s2, %s391_s8  ;;  %p489_p8 = scmp.ne.s32.totalorder %s722_s23, %s488_s18 }
  0x3f   : > { %v251_v2 = vld [vmem:[%s247_s19] sm:$0x3]  ;;  %p786_p11 = scmp.ne.s32.totalorder %s781_s25, 0  ;;  %s573_s15 = smov [#allocation5]  }
  0x40   : > { %vm252_vm0 = vcmp.ge.f32.partialorder %v251_v2, 0.1  ;;  %s492_s7 = sshll.u32 %s573_s15, 4  ;;  %s493_s7 = int_to_ptr.vmem [resolvable:$false] %s492_s7 }
  0x41   : > { %v254_v5 = vsel %vm252_vm0, %v253_v4, 0.0  ;;  %p490_p0 = pnand %p489_p8, %p786_p11  ;;  %s494_s6 = scalar_lea.vmem %s493_s7, 64 }
  0x42   : > { %255 = vst [vmem:[%s236_s24] sm:$0x3] %v254_v5  ;;  %p495_p13 = scmp.lt.s32.totalorder %s722_s23, %s493_s7  ;;  %p496_p3 = scmp.lt.s32.totalorder %s494_s6, %s488_s18 }
  0x43   : > { %p491_p7 = pneg %p490_p0 }
  0x44   : > { %p497_p6 = por %p496_p3, %p495_p13 }
  0x46   : > { %p498_p4 = pnand %p497_p6, %p491_p7 }
  0x48   : > { %501 = shalt.err (!%p498_p4)
}
  0x49   : > { %s502_s5 = scalar_lea.hbm %s727_s4, 32  ;;  %s506_s10 = scalar_lea.hbm %s777_s3, 64 }
  0x4a   : > { %p503_p10 = scmp.ne.s32.totalorder %s727_s4, %s502_s5  ;;  %p507_p2 = scmp.lt.u32.totalorder %s727_s4, %s777_s3 }
  0x4b   : > { %p508_p5 = scmp.lt.u32.totalorder %s506_s10, %s502_s5  ;;  %p510_p8 = scmp.lt.u32.totalorder %s502_s5, %s727_s4 }
  0x4c   : > { %p504_p12 = pnand %p503_p10, %p786_p11 }
  0x4d   : > { %p509_p9 = por %p508_p5, %p507_p2 }
  0x4e   : > { %p505_p1 = pneg %p504_p12 }
  0x4f   : > { %p511_p0 = por %p510_p8, %p509_p9 }
  0x51   : > { %p512_p7 = pnand %p511_p0, %p505_p1 }
  0x53   : > { %515 = shalt.err (!%p512_p7)
}
  0x54   : > { %398 = dma.vmem_to_hbm [thread:$0]  (%p786_p11), %s722_s23, 32, %s727_s4, %s257_s11  }
  0x55 PF: > { %s283_s22 = sand.u32 1, %s550_s12   ;;  %p787_p13 = scmp.ne.s32.totalorder %s782_s27, 0 }
  0x56   : > { %p788_p3 = scmp.ge.s32.totalorder %s570_s17, 2  ;;  %s284_s24 = scalar_lea.sflag [#allocation4], %s283_s22 }
  0x58   : > { %p405_p6 = pnand %p788_p3, %p787_p13 }
  0x5a   : > { %545 = dma.done.wait (!%p405_p6), %s284_s24, 32  }
  0x5b   : > { %547 = vsyncadd (!%p405_p6), %s284_s24, 4294967264  ;;  %s19_s17 = sadd.s32 1, %s570_s17   ;;  %s789_s12 = smov %s554_s13 }
  0x5c   : > { %p16_p4 = scmp.ge.s32.totalorder %s19_s17, 4   ;;  %s790_s13 = smov %s558_s14 }
  0x5d   : > { %s791_s14 = smov %s650_s26  ;;  %s792_s15 = smov %s566_s16 }
  0x5e   : > { %s793_s16 = smov %s795_s20  ;;  %18 = sbr.rel (!%p16_p4) target bundleno = 6 (0x6), region = 83 }
  0x65   :  { %289 = vsyncpa [#allocation3], 1 }
  0x66   :  { %291 = vsyncpa [#allocation3 + $0x1], 1 }
  0x67   :  { %292 = vsyncpa [#allocation4], 1 }
  0x68   :  { %294 = vsyncpa [#allocation4 + $0x1], 1 }

</bundles_post_ra>
